<compile_context>
chip_gen: v6e
topology: v6e:2x2x1
jax: 0.10.0
libtpu: 0.0.40
codegen_flags: <defaults>
</compile_context>

<pallas_src>
import jax
import jax.numpy as jnp
from jax.experimental import pallas as pl
from jax.experimental.pallas import tpu as pltpu


def _round_up(v, m):
    return (v + m - 1) // m * m


def highway_kernel(x_ref, w_ref, b_ref, o_ref):
    e = o_ref.shape[-1]                       # padded embed width (multiple of 128)
    x = x_ref[...]                            # (tile_b, Ep)

    # Fused GEMM: one MXU pass computes both proj and gate pre-activations.
    z = jnp.dot(x, w_ref[...], preferred_element_type=jnp.float32)   # (tile_b, 2Ep)
    z = z + b_ref[...]                        # (1, 2Ep) broadcasts over rows

    zproj = z[:, :e]                          # lane-aligned slices (Ep % 128 == 0)
    zgate = z[:, e:]

    xproj = jnp.maximum(zproj, 0.0)                              # relu    (VPU)
    xgate = pl.reciprocal(1.0 + jnp.exp(-zgate), approx=True)    # sigmoid (EUP)

    xf = x.astype(jnp.float32)
    o_ref[...] = (xgate * xproj + (1.0 - xgate) * xf).astype(o_ref.dtype)


def highway_forward(x, wproj, bproj, wgate, bgate, *, tile_b=None,
                    compute_dtype=None):
    """Highway forward.

    x:           (B, E) activations.
    wproj/wgate: (E, E) weights stored pre-transposed as (in, out), so the
                 kernel computes x @ W + b == PyTorch's x @ W_torch.T + b.
    bproj/bgate: (E,) biases.
    compute_dtype: optional cast for x / weights (e.g. jnp.bfloat16 on
                 v6e/v7x); accumulation and the highway combine stay in f32.
    """
    B, E = x.shape
    out_dtype = x.dtype

    # --- batch tiling: multiple of 8 rows, capped so the grid pipelines ------
    if tile_b is None:
        tile_b = min(512, _round_up(B, 8))
    tile_b = _round_up(tile_b, 8)
    Bp = _round_up(B, tile_b)

    # --- lane-pad embed dim to a multiple of 128 (MXU / store density) -------
    Ep = _round_up(E, 128)

    xp = jnp.pad(x, ((0, Bp - B), (0, Ep - E)))
    wp = jnp.pad(wproj, ((0, Ep - E), (0, Ep - E)))
    wg = jnp.pad(wgate, ((0, Ep - E), (0, Ep - E)))
    wcat = jnp.concatenate([wp, wg], axis=1)                       # (Ep, 2Ep)
    bcat = jnp.concatenate([jnp.pad(bproj, (0, Ep - E)),
                            jnp.pad(bgate, (0, Ep - E))]).reshape(1, 2 * Ep)
    bcat = bcat.astype(jnp.float32)

    if compute_dtype is not None:
        xp = xp.astype(compute_dtype)
        wcat = wcat.astype(compute_dtype)

    grid = (Bp // tile_b,)
    out = pl.pallas_call(
        highway_kernel,
        out_shape=jax.ShapeDtypeStruct((Bp, Ep), out_dtype),
        grid_spec=pltpu.PrefetchScalarGridSpec(
            num_scalar_prefetch=0,
            grid=grid,
            in_specs=[
                pl.BlockSpec((tile_b, Ep), lambda i: (i, 0)),      # x tile
                pl.BlockSpec((Ep, 2 * Ep), lambda i: (0, 0)),      # fused weights (resident)
                pl.BlockSpec((1, 2 * Ep), lambda i: (0, 0)),       # fused bias
            ],
            out_specs=pl.BlockSpec((tile_b, Ep), lambda i: (i, 0)),
        ),
        compiler_params=pltpu.CompilerParams(
            dimension_semantics=("parallel",),
            # Raise above v5e's 16 MiB scoped default; still within v7x's 64 MiB.
            vmem_limit_bytes=48 * 1024 * 1024,
        ),
    )(xp, wcat, bcat)

    # Strip batch / lane padding.
    return out[:B, :E]


def highway_reference(x, wproj, bproj, wgate, bgate):
    """Plain-JAX reference mirroring the PyTorch module."""
    xproj = jax.nn.relu(x @ wproj + bproj)
    xgate = jax.nn.sigmoid(x @ wgate + bgate)
    return xgate * xproj + (1.0 - xgate) * x


if __name__ == "__main__":
    embed_size = 32
    batch = 8  # (batch * seq) rows flattened, as the Highway layer sees them

    key = jax.random.PRNGKey(0)
    kx, kwp, kbp, kwg, kbg = jax.random.split(key, 5)

    # Deterministic parameter init matching nn.Linear shapes.
    # PyTorch stores W as (out, in); we keep it pre-transposed as (in, out).
    bound = 1.0 / jnp.sqrt(embed_size)
    x = jax.random.normal(kx, (batch, embed_size), dtype=jnp.float32)
    wproj = jax.random.uniform(kwp, (embed_size, embed_size), jnp.float32, -bound, bound)
    bproj = jax.random.uniform(kbp, (embed_size,), jnp.float32, -bound, bound)
    wgate = jax.random.uniform(kwg, (embed_size, embed_size), jnp.float32, -bound, bound)
    bgate = jax.random.uniform(kbg, (embed_size,), jnp.float32, -bound, bound)

    out = highway_forward(x, wproj, bproj, wgate, bgate)
    out = jax.block_until_ready(out)

    ref = highway_reference(x, wproj, bproj, wgate, bgate)
    assert out.shape == (batch, embed_size)
    # Tolerance covers the EUP approximate-reciprocal sigmoid (~1e-3 abs err).
    assert jnp.allclose(out, ref, atol=1e-2, rtol=1e-2), "mismatch vs reference"

    print("KERNEL_OK")
</pallas_src>

<mosaic_0001>
module attributes {stable_mosaic.version = 11 : i64} {
  func.func @highway_kernel(%arg0: i32, %arg1: memref<8x128xf32, #tpu.memory_space<vmem>>, %arg2: memref<128x256xf32, #tpu.memory_space<vmem>>, %arg3: memref<1x256xf32, #tpu.memory_space<vmem>>, %arg4: memref<8x128xf32, #tpu.memory_space<vmem>>) attributes {dimension_semantics = [#tpu.dimension_semantics<parallel>], iteration_bounds = array<i64: 1>, scalar_prefetch = 0 : i64, scratch_operands = 0 : i64, tpu.core_type = #tpu.core_type<tc>, window_params = [{transform_indices = @transform_0, window_bounds = array<i64: 8, 128>}, {pipeline_mode = #tpu.pipeline_mode<synchronous>, transform_indices = @transform_1, window_bounds = array<i64: 128, 256>}, {pipeline_mode = #tpu.pipeline_mode<synchronous>, transform_indices = @transform_2, window_bounds = array<i64: 1, 256>}, {transform_indices = @transform_3, window_bounds = array<i64: 8, 128>}]} {
    %c0 = arith.constant 0 : index
    %c0_0 = arith.constant 0 : index
    %0 = vector.load %arg1[%c0, %c0_0] : memref<8x128xf32, #tpu.memory_space<vmem>>, vector<8x128xf32>
    %c0_1 = arith.constant 0 : index
    %c0_2 = arith.constant 0 : index
    %1 = vector.load %arg2[%c0_1, %c0_2] : memref<128x256xf32, #tpu.memory_space<vmem>>, vector<128x256xf32>
    %cst = arith.constant dense<0.000000e+00> : vector<8x256xf32>
    %2 = tpu.matmul %0, %1, %cst {dimension_numbers = #tpu.dot_dimension_numbers<[1], [0], [0], [1], [0, 0, 1, 1], [], []>} : vector<8x128xf32>, vector<128x256xf32>, vector<8x256xf32> -> vector<8x256xf32>
    %c0_3 = arith.constant 0 : index
    %c0_4 = arith.constant 0 : index
    %3 = vector.load %arg3[%c0_3, %c0_4] : memref<1x256xf32, #tpu.memory_space<vmem>>, vector<1x256xf32>
    %4 = vector.broadcast %3 : vector<1x256xf32> to vector<8x256xf32>
    %5 = arith.addf %2, %4 : vector<8x256xf32>
    %6 = vector.extract_strided_slice %5 {offsets = [0, 0], sizes = [8, 128], strides = [1, 1]} : vector<8x256xf32> to vector<8x128xf32>
    %7 = vector.extract_strided_slice %5 {offsets = [0, 128], sizes = [8, 128], strides = [1, 1]} : vector<8x256xf32> to vector<8x128xf32>
    %cst_5 = arith.constant 0.000000e+00 : f32
    %8 = vector.broadcast %cst_5 : f32 to vector<8x128xf32>
    %9 = arith.maximumf %6, %8 : vector<8x128xf32>
    %cst_6 = arith.constant 0.000000e+00 : f32
    %10 = vector.broadcast %cst_6 : f32 to vector<8x128xf32>
    %11 = arith.subf %10, %7 : vector<8x128xf32>
    %12 = math.exp %11 : vector<8x128xf32>
    %cst_7 = arith.constant 1.000000e+00 : f32
    %13 = vector.broadcast %cst_7 : f32 to vector<8x128xf32>
    %14 = arith.addf %13, %12 : vector<8x128xf32>
    %15 = tpu.reciprocal %14 {approx = true} : vector<8x128xf32> -> vector<8x128xf32>
    %16 = arith.mulf %15, %9 : vector<8x128xf32>
    %cst_8 = arith.constant 1.000000e+00 : f32
    %17 = vector.broadcast %cst_8 : f32 to vector<8x128xf32>
    %18 = arith.subf %17, %15 : vector<8x128xf32>
    %19 = arith.mulf %18, %0 : vector<8x128xf32>
    %20 = arith.addf %16, %19 : vector<8x128xf32>
    %c0_9 = arith.constant 0 : index
    %c0_10 = arith.constant 0 : index
    %21 = vector.load %arg4[%c0_9, %c0_10] : memref<8x128xf32, #tpu.memory_space<vmem>>, vector<8x128xf32>
    tpu.vector_store %arg4[%c0_9, %c0_10], %20 {strides = array<i32>} : memref<8x128xf32, #tpu.memory_space<vmem>>, vector<8x128xf32>,
    return
  }
  func.func @transform_0(%arg0: i32) -> (i32, i32) {
    %c0_i32 = arith.constant 0 : i32
    %c0_i32_0 = arith.constant 0 : i32
    return %arg0, %c0_i32 : i32, i32
  }
  func.func @transform_1(%arg0: i32) -> (i32, i32) {
    %c0_i32 = arith.constant 0 : i32
    %c0_i32_0 = arith.constant 0 : i32
    %c0_i32_1 = arith.constant 0 : i32
    return %c0_i32, %c0_i32_0 : i32, i32
  }
  func.func @transform_2(%arg0: i32) -> (i32, i32) {
    %c0_i32 = arith.constant 0 : i32
    %c0_i32_0 = arith.constant 0 : i32
    %c0_i32_1 = arith.constant 0 : i32
    return %c0_i32, %c0_i32_0 : i32, i32
  }
  func.func @transform_3(%arg0: i32) -> (i32, i32) {
    %c0_i32 = arith.constant 0 : i32
    %c0_i32_0 = arith.constant 0 : i32
    return %arg0, %c0_i32 : i32, i32
  }
}

</mosaic_0001>

<bundles_post_ra>
// kernel: tpu_custom_call.1
= control target key start
LH: loop header
LB: loop body
LE: loop exit
PB: predicated region body
PF: predicated region fallthrough
CT: control target
= control target key end

     0   :  { %8 = vsyncpa [#allocation3], 0  ;;  %s298_s0 = inlined_call_operand.hbm [shape: f32[8,128], index: 0, kind: input, shape index: {}]   ;;  %s299_s1 = inlined_call_operand.hbm [shape: f32[128,256], index: 1, kind: input, shape index: {}]   ;;  %s300_s2 = inlined_call_operand.vmem [shape: f32[1,256], index: 2, kind: input, shape index: {}]   ;;  %s301_s3 = inlined_call_operand.hbm [shape: f32[8,128], index: 3, kind: output, shape index: {}]  }
   0x1   :  { %9 = vsyncpa [#allocation6], 0 }
   0x2   :  { %10 = vsyncpa [#allocation4], 0  ;;  %s260_s12 = smov [#allocation2]   ;;  %s261_s14 = smov [#allocation5]  }
   0x3   :  { %s17_s13 = sshll.u32 %s260_s12, 4  ;;  %s26_s15 = sshll.u32 %s261_s14, 4  ;;  %s18_s13 = int_to_ptr.vmem [resolvable:$true] %s17_s13  ;;  %s27_s15 = int_to_ptr.vmem [resolvable:$true] %s26_s15 }
   0x4   :  { %s202_s16 = scalar_lea.vmem %s18_s13, 128  ;;  %p207_p1 = scmp.lt.s32.totalorder %s18_s13, %s18_s13 }
   0x5   :  { %p203_p0 = scmp.ne.s32.totalorder %s18_s13, %s202_s16  ;;  %p208_p2 = scmp.lt.s32.totalorder %s202_s16, %s202_s16 }
   0x7   :  { %p209_p3 = por %p208_p2, %p207_p1 }
   0x9   :  { %p210_p4 = pnand %p209_p3, %p203_p0 }
   0xb   :  { %213 = shalt.err (!%p210_p4)
}
   0xc   :  { %20 = dma.hbm_to_vmem [thread:$0]  %s298_s0, 128, %s18_s13, [#allocation3]  }
   0xd   :  { %s222_s19 = scalar_lea.vmem %s27_s15, 4096  ;;  %p227_p6 = scmp.lt.s32.totalorder %s27_s15, %s27_s15 }
   0xe   :  { %p223_p5 = scmp.ne.s32.totalorder %s27_s15, %s222_s19  ;;  %p228_p7 = scmp.lt.s32.totalorder %s222_s19, %s222_s19 }
  0x10   :  { %p229_p8 = por %p228_p7, %p227_p6 }
  0x12   :  { %p230_p9 = pnand %p229_p8, %p223_p5 }
  0x14   :  { %233 = shalt.err (!%p230_p9)
}
  0x15   :  { %s262_s20 = smov 256   ;;  %s263_s21 = smov 16  }
  0x16   :  { %32 = dma.hbm_to_vmem [thread:$0]  %s299_s1, 4096, %s27_s15, [#allocation6], %s262_s20, %s262_s20, %s263_s21  }
  0x17   :  { %254 = dma.done.wait [#allocation3], 128  }
  0x18   :  { %255 = vsyncadd [#allocation3], 4294967168 }
  0x19   :  { %256 = dma.done.wait [#allocation6], 4096  }
  0x1a   :  { %257 = vsyncadd [#allocation6], 4294963200  ;;  %v264_v0 = vmov 0.0   ;;  %v73_v1 = vld [vmem:[#allocation5 + $0xf8] sm:$0xff]  ;;  %v72_v2 = vld [vmem:[#allocation5 + $0xf0] sm:$0xff]  ;;  %v76_v34 = vlaneseq  ;;  %s265_s24 = smov [#allocation7]  }
  0x1b   :  { %150 = vmatprep.mubr.f32.mxu0 %v264_v0  ;;  %v71_v3 = vld [vmem:[#allocation5 + $0xe8] sm:$0xff]  ;;  %86 = vmatprep.subr.mxu0 %v73_v1  ;;  %v70_v4 = vld [vmem:[#allocation5 + $0xe0] sm:$0xff]  ;;  %v69_v5 = vld [vmem:[#allocation5 + $0xd8] sm:$0xff]  ;;  %s174_s25 = sshll.u32 %s265_s24, 4  ;;  %s175_s25 = int_to_ptr.vmem [resolvable:$true] %s174_s25 }
  0x1c   :  { %87 = vmatpush1.msra.mxu0 %v72_v2  ;;  %v68_v6 = vld [vmem:[#allocation5 + $0xd0] sm:$0xff]  ;;  %v67_v7 = vld [vmem:[#allocation5 + $0xc8] sm:$0xff]  ;;  %v66_v8 = vld [vmem:[#allocation5 + $0xc0] sm:$0xff]  ;;  %v77_v35 = vshrl.u32 %v76_v34, 7  ;;  %p239_p11 = scmp.lt.s32.totalorder %s175_s25, %s175_s25 }
  0x1d   :  { %88 = vmatprep.subr.mxu0 %v71_v3  ;;  %v65_v9 = vld [vmem:[#allocation5 + $0xb8] sm:$0xff]  ;;  %v64_v10 = vld [vmem:[#allocation5 + $0xb0] sm:$0xff]  ;;  %v63_v11 = vld [vmem:[#allocation5 + $0xa8] sm:$0xff] }
  0x1e   :  { %89 = vmatpush1.msra.mxu0 %v70_v4  ;;  %v62_v12 = vld [vmem:[#allocation5 + $0xa0] sm:$0xff]  ;;  %v61_v13 = vld [vmem:[#allocation5 + $0x98] sm:$0xff]  ;;  %v60_v14 = vld [vmem:[#allocation5 + $0x90] sm:$0xff]  ;;  %v82_v36 = vsub.s32 1, %v77_v35  ;;  %v78_v46 = vsub.s32 0, %v77_v35 }
  0x1f   :  { %90 = vmatprep.subr.mxu0 %v69_v5  ;;  %v59_v15 = vld [vmem:[#allocation5 + $0x88] sm:$0xff]  ;;  %v58_v16 = vld [vmem:[#allocation5 + $0x80] sm:$0xff]  ;;  %v57_v17 = vld [vmem:[#allocation5 + $0x78] sm:$0xff] }
  0x20   :  { %91 = vmatpush1.msra.mxu0 %v68_v6  ;;  %v56_v18 = vld [vmem:[#allocation5 + $0x70] sm:$0xff]  ;;  %v55_v19 = vld [vmem:[#allocation5 + $0x68] sm:$0xff]  ;;  %v54_v20 = vld [vmem:[#allocation5 + $0x60] sm:$0xff] }
  0x21   :  { %92 = vmatprep.subr.mxu0 %v67_v7  ;;  %v53_v21 = vld [vmem:[#allocation5 + $0x58] sm:$0xff]  ;;  %v52_v22 = vld [vmem:[#allocation5 + $0x50] sm:$0xff]  ;;  %v51_v23 = vld [vmem:[#allocation5 + $0x48] sm:$0xff] }
  0x22   :  { %93 = vmatpush1.msra.mxu0 %v66_v8  ;;  %v50_v24 = vld [vmem:[#allocation5 + $0x40] sm:$0xff]  ;;  %v49_v25 = vld [vmem:[#allocation5 + $0x38] sm:$0xff]  ;;  %v48_v26 = vld [vmem:[#allocation5 + $0x30] sm:$0xff] }
  0x23   :  { %94 = vmatprep.subr.mxu0 %v65_v9  ;;  %v47_v27 = vld [vmem:[#allocation5 + $0x28] sm:$0xff]  ;;  %v46_v28 = vld [vmem:[#allocation5 + $0x20] sm:$0xff]  ;;  %v45_v29 = vld [vmem:[#allocation5 + $0x18] sm:$0xff] }
  0x24   :  { %95 = vmatpush1.msra.mxu0 %v64_v10  ;;  %v44_v30 = vld [vmem:[#allocation5 + $0x10] sm:$0xff]  ;;  %v43_v31 = vld [vmem:[#allocation5 + $0x8] sm:$0xff]  ;;  %v42_v32 = vld [vmem:[#allocation5] sm:$0xff] }
  0x25   :  { %96 = vmatprep.subr.mxu0 %v63_v11  ;;  %v41_v33 = vld [vmem:[#allocation2] sm:$0xff] }
  0x26   :  { %97 = vmatpush1.msra.mxu0 %v62_v12  ;;  %v74_v37 = vld [vmem:[%s300_s2] sm:$0x3]  ;;  %s234_s2 = scalar_lea.vmem %s175_s25, 128 }
  0x27   :  { %98 = vmatprep.subr.mxu0 %v61_v13  ;;  %v83_v38 = vrot.slane %v74_v37, %v82_v36  ;;  %v79_v47 = vrot.slane %v74_v37, %v78_v46  ;;  %p235_p10 = scmp.ne.s32.totalorder %s175_s25, %s234_s2  ;;  %p240_p12 = scmp.lt.s32.totalorder %s234_s2, %s234_s2 }
  0x28   :  { %99 = vmatpush1.msra.mxu0 %v60_v14 }
  0x29   :  { %100 = vmatprep.subr.mxu0 %v59_v15  ;;  %p241_p13 = por %p240_p12, %p239_p11 }
  0x2a   :  { %101 = vmatpush1.msra.mxu0 %v58_v16 }
  0x2b   :  { %102 = vmatprep.subr.mxu0 %v57_v17  ;;  %p242_p0 = pnand %p241_p13, %p235_p10 }
  0x2c   :  { %103 = vmatpush1.msra.mxu0 %v56_v18 }
  0x2d   :  { %104 = vmatprep.subr.mxu0 %v55_v19 }
  0x2e   :  { %105 = vmatpush1.msra.mxu0 %v54_v20 }
  0x2f   :  { %106 = vmatprep.subr.mxu0 %v53_v21 }
  0x30   :  { %107 = vmatpush1.msra.mxu0 %v52_v22 }
  0x31   :  { %108 = vmatprep.subr.mxu0 %v51_v23 }
  0x32   :  { %109 = vmatpush1.msra.mxu0 %v50_v24 }
  0x33   :  { %110 = vmatprep.subr.mxu0 %v49_v25 }
  0x34   :  { %111 = vmatpush1.msra.mxu0 %v48_v26 }
  0x35   :  { %112 = vmatprep.subr.mxu0 %v47_v27 }
  0x36   :  { %113 = vmatpush1.msra.mxu0 %v46_v28 }
  0x37   :  { %114 = vmatprep.subr.mxu0 %v45_v29 }
  0x38   :  { %115 = vmatpush1.msra.mxu0 %v44_v30 }
  0x39   :  { %116 = vmatprep.subr.mxu0 %v43_v31 }
  0x3a   :  { %117 = vmatpush1.msra.mxu0 %v42_v32 }
  0x3b   :  { %151 = vmatmul.mubr.f32.vlgmr.msra.gmra.mxu0 %v41_v33 }
  0xfb   :  { %v152_v39 = vpop.f32.mrf.mxu0 }
  0xfc   :  { %v153_v48 = vadd.f32 %v152_v39, %v79_v47 }
  0xfd   :  { %v154_v40 = vpop.f32.mrf.mxu0 }
  0xfe   :  { %v155_v41 = vadd.f32 %v154_v40, %v83_v38  ;;  %v157_v50 = vmax.f32 %v153_v48, 0.0 }
 0x100   :  { %v158_v42 = vsub.f32 0.0, %v155_v41 }
 0x102   :  { %v159_v43 = vmul.f32 1.442695, %v158_v42 }
 0x104   :  { %190 = vpow2.f32 %v159_v43 }
 0x111   :  { %v191_v44 = vpop.eup %190 }
 0x112   :  { %v161_v45 = vadd.f32 1.0, %v191_v44 }
 0x114   :  { %192 = vrcp.f32 %v161_v45 }
 0x121   :  { %v193_v49 = vpop.eup %192 }
 0x122   :  { %v164_v51 = vsub.f32 1.0, %v193_v49  ;;  %v163_v52 = vmul.f32 %v193_v49, %v157_v50 }
 0x124   :  { %v165_v53 = vmul.f32 %v164_v51, %v41_v33 }
 0x126   :  { %v166_v54 = vadd.f32 %v165_v53, %v163_v52 }
 0x128   :  { %167 = vst [vmem:[#allocation7] sm:$0xff] %v166_v54 }
 0x129   :  { %245 = shalt.err (!%p242_p0)
}
 0x12a   :  { %177 = dma.vmem_to_hbm [thread:$0]  %s175_s25, 128, %s301_s3, [#allocation4]  }
 0x12b   :  { %258 = dma.done.wait [#allocation4], 128  }
 0x12c   :  { %259 = vsyncadd [#allocation4], 4294967168 }
 0x12d   :  { %181 = vsyncpa [#allocation3], 1 }
 0x12e   :  { %182 = vsyncpa [#allocation6], 1 }
 0x12f   :  { %183 = vsyncpa [#allocation4], 1 }

</bundles_post_ra>
